<compile_context>
chip_gen: v7x
topology: tpu7x:2x2x1
jax: 0.10.0
libtpu: 0.0.40
codegen_flags: <defaults>
</compile_context>

<pallas_src>
import functools

import jax
import jax.numpy as jnp
from jax.experimental import pallas as pl
from jax.experimental.pallas import tpu as pltpu


def synapse_kernel(e_ref, w_ref, o_ref, *, dt):
    """One (tb, td) output tile, accumulated over the K (=A) grid axis.

    The output block index is constant across k, so o_ref stays VMEM-resident
    for the whole reduction and we accumulate into it directly.
    """
    k = pl.program_id(2)

    @pl.when(k == 0)
    def _init():
        o_ref[...] = jnp.zeros_like(o_ref)

    o_ref[...] += jnp.dot(e_ref[...], w_ref[...],
                          preferred_element_type=jnp.float32)

    @pl.when(k == pl.num_programs(2) - 1)
    def _finalize():
        o_ref[...] = o_ref[...] * dt


def _round_up(x, m):
    return (x + m - 1) // m * m


def synapse_forward(e, mask, w, dt, *, tb=512, td=1024, ta=512):
    """Masked dense synapse: I = dt * (e * mask) @ w.

    e    : [B, A] f32        batched release (B = timesteps / parallel networks)
    mask : [1, A] or [A] f32 synapse mask, broadcast over the batch
    w    : [A, D] bf16/f32   synaptic weights (terminal -> dendrite)
    out  : [B, D] f32        dendrite input current
    """
    B, A = e.shape
    Aw, D = w.shape
    assert Aw == A
    if mask.ndim == 1:
        mask = mask[None, :]
    assert mask.shape == (1, A)

    # Clamp tiles to the (aligned) problem dims so small inputs still satisfy
    # the (8, 128) block constraint while big inputs get the large tiles.
    tb = min(tb, _round_up(B, 8))      # sublane axis of e / out
    ta = min(ta, _round_up(A, 128))    # lane axis of e, sublane axis of w
    td = min(td, _round_up(D, 128))    # lane axis of w / out

    Bp, Ap, Dp = _round_up(B, tb), _round_up(A, ta), _round_up(D, td)

    # Pre-mask + downcast e in the wrapper (fused with the pad): one less DMA
    # stream, half the e HBM bytes when w is bf16, zero per-step VPU work.
    # Padded rows/cols are zero, so they contribute nothing to the contraction.
    e_masked = (e * mask).astype(w.dtype)
    e_p = jnp.pad(e_masked, ((0, Bp - B), (0, Ap - A)))
    w_p = jnp.pad(w, ((0, Ap - A), (0, Dp - D)))

    grid = (Bp // tb, Dp // td, Ap // ta)

    # Double-buffered working set: 2*(e tile + w tile) + 2*out tile (+ margin).
    ebytes = jnp.dtype(e_p.dtype).itemsize
    wbytes = jnp.dtype(w_p.dtype).itemsize
    working = 2 * (tb * ta * ebytes + ta * td * wbytes) + 2 * tb * td * 4
    vmem_limit = int(min(max(2 * working, 32 << 20), 64 << 20))

    out = pl.pallas_call(
        functools.partial(synapse_kernel, dt=float(dt)),
        out_shape=jax.ShapeDtypeStruct((Bp, Dp), jnp.float32),
        grid=grid,
        in_specs=[
            pl.BlockSpec((tb, ta), lambda b, d, k: (b, k)),   # masked e (w.dtype)
            pl.BlockSpec((ta, td), lambda b, d, k: (k, d)),   # w
        ],
        out_specs=pl.BlockSpec((tb, td), lambda b, d, k: (b, d)),
        compiler_params=pltpu.CompilerParams(
            dimension_semantics=("parallel", "parallel", "arbitrary"),
            vmem_limit_bytes=vmem_limit),
    )(e_p, w_p)

    return out[:B, :D]


if __name__ == "__main__":
    dt = 0.5
    key = jax.random.PRNGKey(0)
    k_e, k_w, k_m, k_e2, k_w2, k_m2 = jax.random.split(key, 6)

    # ---- Test 1: small, lane/sublane-friendly shapes -------------------------
    B, A, D = 8, 64, 96
    e = (jax.random.uniform(k_e, (B, A)) > 0.7).astype(jnp.float32)       # spikes
    mask = (jax.random.uniform(k_m, (1, A)) > 0.25).astype(jnp.float32)   # synapse mask
    w = (jax.random.normal(k_w, (A, D), dtype=jnp.float32) * 0.1).astype(jnp.bfloat16)

    out = jax.block_until_ready(synapse_forward(e, mask, w, dt))
    ref = jnp.dot((e * mask).astype(jnp.bfloat16), w,
                  preferred_element_type=jnp.float32) * dt
    assert out.shape == (B, D)
    assert jnp.allclose(out, ref, atol=1e-3, rtol=1e-3)

    # ---- Test 2: ragged shapes exercise the zero-pad / slice path ------------
    B2, A2, D2 = 5, 37, 70
    e2 = (jax.random.uniform(k_e2, (B2, A2)) > 0.5).astype(jnp.float32)
    mask2 = (jax.random.uniform(k_m2, (1, A2)) > 0.25).astype(jnp.float32)
    w2 = (jax.random.normal(k_w2, (A2, D2), dtype=jnp.float32) * 0.1).astype(jnp.bfloat16)

    out2 = jax.block_until_ready(synapse_forward(e2, mask2, w2, dt))
    ref2 = jnp.dot((e2 * mask2).astype(jnp.bfloat16), w2,
                   preferred_element_type=jnp.float32) * dt
    assert out2.shape == (B2, D2)
    assert jnp.allclose(out2, ref2, atol=1e-3, rtol=1e-3)

    print("KERNEL_OK")
</pallas_src>

<mosaic_0001>
module attributes {stable_mosaic.version = 11 : i64} {
  func.func @synapse_kernel(%arg0: i32, %arg1: i32, %arg2: i32, %arg3: memref<8x128xbf16, #tpu.memory_space<vmem>>, %arg4: memref<128x128xbf16, #tpu.memory_space<vmem>>, %arg5: memref<8x128xf32, #tpu.memory_space<vmem>>) attributes {dimension_semantics = [#tpu.dimension_semantics<parallel>, #tpu.dimension_semantics<parallel>, #tpu.dimension_semantics<arbitrary>], iteration_bounds = array<i64: 1, 1, 1>, scalar_prefetch = 0 : i64, scratch_operands = 0 : i64, tpu.core_type = #tpu.core_type<tc>, window_params = [{transform_indices = @transform_0, window_bounds = array<i64: 8, 128>}, {transform_indices = @transform_1, window_bounds = array<i64: 128, 128>}, {transform_indices = @transform_2, window_bounds = array<i64: 8, 128>}]} {
    %c0_i32 = arith.constant 0 : i32
    %0 = arith.cmpi eq, %arg2, %c0_i32 : i32
    %1 = arith.extui %0 : i1 to i32
    %c0_i32_0 = arith.constant 0 : i32
    %2 = arith.cmpi ne, %1, %c0_i32_0 : i32
    scf.if %2 {
      %cst_10 = arith.constant 0.000000e+00 : f32
      %12 = vector.broadcast %cst_10 : f32 to vector<8x128xf32>
      %c0_11 = arith.constant 0 : index
      %c0_12 = arith.constant 0 : index
      %13 = vector.load %arg5[%c0_11, %c0_12] : memref<8x128xf32, #tpu.memory_space<vmem>>, vector<8x128xf32>
      tpu.vector_store %arg5[%c0_11, %c0_12], %12 {strides = array<i32>} : memref<8x128xf32, #tpu.memory_space<vmem>>, vector<8x128xf32>,
    } else {
    }
    %c0 = arith.constant 0 : index
    %c0_1 = arith.constant 0 : index
    %3 = vector.load %arg5[%c0, %c0_1] : memref<8x128xf32, #tpu.memory_space<vmem>>, vector<8x128xf32>
    %c0_2 = arith.constant 0 : index
    %c0_3 = arith.constant 0 : index
    %4 = vector.load %arg3[%c0_2, %c0_3] : memref<8x128xbf16, #tpu.memory_space<vmem>>, vector<8x128xbf16>
    %c0_4 = arith.constant 0 : index
    %c0_5 = arith.constant 0 : index
    %5 = vector.load %arg4[%c0_4, %c0_5] : memref<128x128xbf16, #tpu.memory_space<vmem>>, vector<128x128xbf16>
    %cst = arith.constant dense<0.000000e+00> : vector<8x128xf32>
    %6 = tpu.matmul %4, %5, %cst {dimension_numbers = #tpu.dot_dimension_numbers<[1], [0], [0], [1], [0, 0, 1, 1], [], []>} : vector<8x128xbf16>, vector<128x128xbf16>, vector<8x128xf32> -> vector<8x128xf32>
    %7 = arith.addf %3, %6 : vector<8x128xf32>
    %c0_6 = arith.constant 0 : index
    %c0_7 = arith.constant 0 : index
    %8 = vector.load %arg5[%c0_6, %c0_7] : memref<8x128xf32, #tpu.memory_space<vmem>>, vector<8x128xf32>
    tpu.vector_store %arg5[%c0_6, %c0_7], %7 {strides = array<i32>} : memref<8x128xf32, #tpu.memory_space<vmem>>, vector<8x128xf32>,
    %c0_i32_8 = arith.constant 0 : i32
    %9 = arith.cmpi eq, %arg2, %c0_i32_8 : i32
    %10 = arith.extui %9 : i1 to i32
    %c0_i32_9 = arith.constant 0 : i32
    %11 = arith.cmpi ne, %10, %c0_i32_9 : i32
    scf.if %11 {
      %c0_10 = arith.constant 0 : index
      %c0_11 = arith.constant 0 : index
      %12 = vector.load %arg5[%c0_10, %c0_11] : memref<8x128xf32, #tpu.memory_space<vmem>>, vector<8x128xf32>
      %cst_12 = arith.constant 5.000000e-01 : f32
      %13 = vector.broadcast %cst_12 : f32 to vector<8x128xf32>
      %14 = arith.mulf %12, %13 : vector<8x128xf32>
      %c0_13 = arith.constant 0 : index
      %c0_14 = arith.constant 0 : index
      %15 = vector.load %arg5[%c0_13, %c0_14] : memref<8x128xf32, #tpu.memory_space<vmem>>, vector<8x128xf32>
      tpu.vector_store %arg5[%c0_13, %c0_14], %14 {strides = array<i32>} : memref<8x128xf32, #tpu.memory_space<vmem>>, vector<8x128xf32>,
    } else {
    }
    return
  }
  func.func @transform_0(%arg0: i32, %arg1: i32, %arg2: i32) -> (i32, i32) {
    %c0_i32 = arith.constant 0 : i32
    return %arg0, %arg2 : i32, i32
  }
  func.func @transform_1(%arg0: i32, %arg1: i32, %arg2: i32) -> (i32, i32) {
    %c0_i32 = arith.constant 0 : i32
    return %arg2, %arg1 : i32, i32
  }
  func.func @transform_2(%arg0: i32, %arg1: i32, %arg2: i32) -> (i32, i32) {
    %c0_i32 = arith.constant 0 : i32
    return %arg0, %arg1 : i32, i32
  }
}

</mosaic_0001>

<bundles_post_ra>
// kernel: tpu_custom_call.1
= control target key start
LH: loop header
LB: loop body
LE: loop exit
PB: predicated region body
PF: predicated region fallthrough
CT: control target
= control target key end

     0   :  { %7 = vsyncpa [#allocation3], 0  ;;  %s363_s0 = inlined_call_operand.hbm [shape: bf16[8,128], index: 0, kind: input, shape index: {}]   ;;  %s364_s1 = inlined_call_operand.hbm [shape: bf16[128,128], index: 1, kind: input, shape index: {}]   ;;  %s365_s2 = inlined_call_operand.hbm [shape: f32[8,128], index: 2, kind: output, shape index: {}]  }
   0x1   :  { %8 = vsyncpa [#allocation6], 0 }
   0x2   :  { %9 = vsyncpa [#allocation4], 0  ;;  %s298_s9 = smov [#allocation2]   ;;  %s299_s11 = smov [#allocation5]  }
   0x3   :  { %s16_s10 = sshll.u32 %s298_s9, 4  ;;  %s25_s12 = sshll.u32 %s299_s11, 4  ;;  %s17_s10 = int_to_ptr.vmem [resolvable:$true] %s16_s10  ;;  %s320_s12 = int_to_ptr.vmem [resolvable:$true] %s25_s12 }
   0x4   :  { %s226_s15 = scalar_lea.hbm %s363_s0, 64 }
   0x5   :  { %p227_p0 = scmp.ne.s32.totalorder %s363_s0, %s226_s15  ;;  %p230_p1 = scmp.lt.u32.totalorder %s226_s15, %s363_s0 }
   0x7   :  { %p232_p2 = pnand %p230_p1, %p227_p0 }
   0x9   :  { %235 = shalt.err (!%p232_p2)
}
   0xa   :  { %s236_s20 = scalar_lea.vmem %s17_s10, 64  ;;  %p241_p4 = scmp.lt.s32.totalorder %s17_s10, %s17_s10 }
   0xb   :  { %p237_p3 = scmp.ne.s32.totalorder %s17_s10, %s236_s20  ;;  %p242_p5 = scmp.lt.s32.totalorder %s236_s20, %s236_s20 }
   0xd   :  { %p243_p6 = por %p242_p5, %p241_p4 }
   0xf   :  { %p244_p7 = pnand %p243_p6, %p237_p3 }
  0x11   :  { %247 = shalt.err (!%p244_p7)
}
  0x12   :  { %19 = dma.hbm_to_vmem [thread:$0]  %s363_s0, 64, %s17_s10, [#allocation3]  }
  0x13   :  { %s248_s25 = scalar_lea.hbm %s364_s1, 1024 }
  0x14   :  { %p249_p8 = scmp.ne.s32.totalorder %s364_s1, %s248_s25  ;;  %p252_p9 = scmp.lt.u32.totalorder %s248_s25, %s364_s1 }
  0x16   :  { %p254_p10 = pnand %p252_p9, %p249_p8 }
  0x18   :  { %257 = shalt.err (!%p254_p10)
}
  0x19   :  { %s258_s30 = scalar_lea.vmem %s320_s12, 1024  ;;  %p263_p12 = scmp.lt.s32.totalorder %s320_s12, %s320_s12 }
  0x1a   :  { %p259_p11 = scmp.ne.s32.totalorder %s320_s12, %s258_s30  ;;  %p264_p13 = scmp.lt.s32.totalorder %s258_s30, %s258_s30 }
  0x1c   :  { %p265_p0 = por %p264_p13, %p263_p12 }
  0x1e   :  { %p266_p1 = pnand %p265_p0, %p259_p11 }
  0x20   :  { %269 = shalt.err (!%p266_p1)
}
  0x21   :  { %s300_s0 = smov 64   ;;  %s301_s3 = smov 4  }
  0x22   :  { %31 = dma.hbm_to_vmem [thread:$0]  %s364_s1, 1024, %s320_s12, [#allocation6], %s300_s0, %s300_s0, %s301_s3  }
  0x23   :  { %292 = dma.done.wait [#allocation3], 64  }
  0x24   :  { %293 = vsyncadd [#allocation3], 4294967232 }
  0x25   :  { %294 = dma.done.wait [#allocation6], 1024  }
  0x26   :  { %295 = vsyncadd [#allocation6], 4294966272  ;;  %v302_v0 = vmov 0.0   ;;  %vm303_vm0 = vmmov 0   ;;  %v218_v1 = vld [vmem:[#allocation5] sm:$0xff]   ;;  %v219_v2 = vld [vmem:[#allocation5 + $0x8] sm:$0xff]  }
  0x27   :  { %191 = vmatprep.subr.bf16.mxu0 %v302_v0  ;;  %207 = vmatprep.mubr.msk.bf16.mxu0 %vm303_vm0, %v302_v0  ;;  %v220_v3 = vld [vmem:[#allocation5 + $0x10] sm:$0xff]   ;;  %v221_v4 = vld [vmem:[#allocation5 + $0x18] sm:$0xff]   ;;  %v222_v5 = vld [vmem:[#allocation5 + $0x20] sm:$0xff]   ;;  %s304_s1 = smov [#allocation7]  }
  0x28   :  { %192 = vmatpush3.bf16.msra.mxu0 %v218_v1  ;;  %v223_v6 = vld [vmem:[#allocation5 + $0x28] sm:$0xff]   ;;  %v224_v7 = vld [vmem:[#allocation5 + $0x30] sm:$0xff]   ;;  %v225_v8 = vld [vmem:[#allocation5 + $0x38] sm:$0xff]   ;;  %s164_s6 = sshll.u32 %s304_s1, 4  ;;  %s165_s6 = int_to_ptr.vmem [resolvable:$true] %s164_s6 }
  0x29   :  { %193 = vmatprep.subr.bf16.mxu0 %v302_v0  ;;  %v45_v9 = vld [vmem:[#allocation2] sm:$0xf]  ;;  %s270_s7 = scalar_lea.vmem %s165_s6, 128  ;;  %p275_p3 = scmp.lt.s32.totalorder %s165_s6, %s165_s6 }
  0x2a   :  { %p271_p2 = scmp.ne.s32.totalorder %s165_s6, %s270_s7  ;;  %p276_p4 = scmp.lt.s32.totalorder %s270_s7, %s270_s7 }
  0x2c   :  { %194 = vmatpush3.bf16.msra.mxu0 %v219_v2  ;;  %p277_p5 = por %p276_p4, %p275_p3 }
  0x2d   :  { %195 = vmatprep.subr.bf16.mxu0 %v302_v0 }
  0x2e   :  { %p278_p6 = pnand %p277_p5, %p271_p2 }
  0x30   :  { %196 = vmatpush3.bf16.msra.mxu0 %v220_v3 }
  0x31   :  { %197 = vmatprep.subr.bf16.mxu0 %v302_v0 }
  0x34   :  { %198 = vmatpush3.bf16.msra.mxu0 %v221_v4 }
  0x35   :  { %199 = vmatprep.subr.bf16.mxu0 %v302_v0 }
  0x38   :  { %200 = vmatpush3.bf16.msra.mxu0 %v222_v5 }
  0x39   :  { %201 = vmatprep.subr.bf16.mxu0 %v302_v0 }
  0x3c   :  { %202 = vmatpush3.bf16.msra.mxu0 %v223_v6 }
  0x3d   :  { %203 = vmatprep.subr.bf16.mxu0 %v302_v0 }
  0x40   :  { %204 = vmatpush3.bf16.msra.mxu0 %v224_v7 }
  0x41   :  { %205 = vmatprep.subr.bf16.mxu0 %v302_v0 }
  0x44   :  { %206 = vmatpush3.bf16.msra.mxu0 %v225_v8 }
  0x47   :  { %208 = vmatmul.mubr.bf16.vlgmr.msra.gmra.mrb[0].mxu0 %v45_v9 }
 0x11a   :  { %v144_v10 = vpop.f32.mrb[0].mxu0 }
 0x11b   :  { %v209_v11 = vpop.f32.mrb[1].mxu0  ;;  %v156_v14 = vmul.f32 0.5, %v144_v10 }
 0x11c   :  { %v147_v12 = vpop.f32.mrb[2].mxu0 }
 0x11d   :  { %v210_v13 = vpop.f32.mrb[3].mxu0  ;;  %157 = vst [vmem:[#allocation7] sm:$0xff] %v156_v14 }
 0x11e   :  { %281 = shalt.err (!%p278_p6)
}
 0x11f   :  { %s282_s10 = scalar_lea.hbm %s365_s2, 128 }
 0x120   :  { %p283_p7 = scmp.ne.s32.totalorder %s365_s2, %s282_s10  ;;  %p286_p8 = scmp.lt.u32.totalorder %s282_s10, %s365_s2 }
 0x122   :  { %p288_p9 = pnand %p286_p8, %p283_p7 }
 0x124   :  { %291 = shalt.err (!%p288_p9)
}
 0x125   :  { %167 = dma.vmem_to_hbm [thread:$0]  %s165_s6, 128, %s365_s2, [#allocation4]  }
 0x126   :  { %296 = dma.done.wait [#allocation4], 128  }
 0x127   :  { %297 = vsyncadd [#allocation4], 4294967168 }
 0x128   :  { %171 = vsyncpa [#allocation3], 1 }
 0x129   :  { %172 = vsyncpa [#allocation6], 1 }
 0x12a   :  { %173 = vsyncpa [#allocation4], 1 }

</bundles_post_ra>
